<compile_context>
chip_gen: v7x
topology: tpu7x:2x2x1
jax: 0.10.0
libtpu: 0.0.40
codegen_flags: <defaults>
</compile_context>

<pallas_src>
import functools

import numpy as np
import jax
import jax.numpy as jnp
from jax.experimental import pallas as pl
from jax.experimental.pallas import tpu as pltpu


# ----------------------------- Pallas kernel --------------------------------
def _mvn_kernel(scale_ref, bias_ref, x_ref, o_ref):
    """out = x * scale + bias  (border pixels already hold the fill value).

    x_ref     : VMEM f32[bn, F]  fill-padded, CHW-flattened images (F = C*Hp*Wp)
    scale_ref : VMEM f32[1,  F]  per-channel 1/var expanded across each plane
    bias_ref  : VMEM f32[1,  F]  per-channel -mean/var expanded across each plane
    o_ref     : VMEM f32[bn, F]
    """
    o_ref[...] = x_ref[...] * scale_ref[...] + bias_ref[...]


def _choose_bn(n, f, target_bytes=4 << 20):
    """Pick the batch-block size bn and the padded batch count.

    bn is a multiple of 8 (sublane-aligned) unless one block covers the whole
    (small) batch.  Actual VMEM use ~ 4x target (2x in + 2x out double-buffered).
    """
    per_row = max(f * 4, 1)
    bn = max(1, target_bytes // per_row)
    if bn >= n:
        if n < 16:
            return n, n                  # single block; dims equal full array dims
        bn = n // 2                      # keep >= 2 grid steps (v7x megacore)
    bn = max(8, (bn // 8) * 8)           # 8-aligned sublanes
    n_pad = ((n + bn - 1) // bn) * bn    # pad N instead of shrinking bn
    return bn, n_pad


# ------------------------------ jitted wrapper --------------------------------
@functools.partial(jax.jit, static_argnames=("pad",))
def _pad_mvn_batched(x_hwc, scale_c, bias_c, fill_c, *, pad):
    """x_hwc: [N, H, W, C] in native dtype.  Returns f32[N, C, H+2p, W+2p]."""
    N, H, W, C = x_hwc.shape
    Hp, Wp = H + 2 * pad, W + 2 * pad
    L = Hp * Wp
    F = C * L

    # --- single fused XLA pre-pass: cast + transpose + fill-pad + flatten ----
    x = x_hwc.astype(jnp.float32)                                  # on-device cast
    x = jnp.transpose(x, (0, 3, 1, 2))                             # (N, C, H, W)
    x = jnp.pad(x, ((0, 0), (0, 0), (pad, pad), (pad, pad)))       # zero border
    r = jnp.arange(Hp)
    c = jnp.arange(Wp)
    interior = (((r >= pad) & (r < pad + H))[:, None]
                & ((c >= pad) & (c < pad + W))[None, :])
    # overwrite border with the per-channel (saturate-cast) fill value so the
    # kernel can normalize border and interior uniformly (no mask blend).
    x = jnp.where(interior[None, None], x, fill_c.reshape(1, C, 1, 1))
    x = x.reshape(N, F)                                            # lane-dense 2D

    bn, n_pad = _choose_bn(N, F)
    if n_pad > N:
        x = jnp.pad(x, ((0, n_pad - N), (0, 0)))                   # fused into pre-pass

    # Per-channel constants pre-expanded to (1, F) scale/bias slabs.
    scale = jnp.broadcast_to(scale_c[:, None], (C, L)).reshape(1, F)
    bias = jnp.broadcast_to(bias_c[:, None], (C, L)).reshape(1, F)

    # TODO(synk): very large images (F*4*bn exceeding the VMEM budget) would need
    # an additional grid axis tiling the flattened plane; blocks currently tile
    # over the batch dimension only.
    out = pl.pallas_call(
        _mvn_kernel,
        out_shape=jax.ShapeDtypeStruct((n_pad, F), jnp.float32),
        grid=(n_pad // bn,),
        in_specs=[
            pl.BlockSpec((1, F), lambda i: (0, 0)),    # scale slab (constant block)
            pl.BlockSpec((1, F), lambda i: (0, 0)),    # bias  slab (constant block)
            pl.BlockSpec((bn, F), lambda i: (i, 0)),   # images
        ],
        out_specs=pl.BlockSpec((bn, F), lambda i: (i, 0)),
        compiler_params=pltpu.CompilerParams(
            dimension_semantics=("parallel",),
            vmem_limit_bytes=32 << 20,
        ),
    )(scale, bias, x)

    return out[:N].reshape(N, C, Hp, Wp)


# ------------------------------ module port -----------------------------------
class NekoListPaddingRgbMvnDev:
    """JAX/Pallas port of neko_list_padding_rgb_mvn_dev (deterministic params)."""

    def __init__(self, param=None):
        param = param or {}
        self.mean_val = param.get("mean", [127.5])
        self.var_val = param.get("var", [128])
        self.padval = param.get("padval", 3)
        # non-trainable buffers of the torch module, kept for parity
        self.mean = jnp.asarray(self.mean_val, jnp.float32).reshape(1, -1, 1, 1)
        self.var = jnp.asarray(self.var_val, jnp.float32).reshape(1, -1, 1, 1)
        # TODO(synk): the '2dstat' (per-pixel mean/var image) branch of the parent
        # class is not exercised by this padding subclass and is not implemented.

    def _channel_params(self, C, np_dtype):
        mean_c = np.broadcast_to(
            np.asarray(self.mean_val, np.float64).reshape(-1), (C,))
        var_c = np.broadcast_to(
            np.asarray(self.var_val, np.float64).reshape(-1), (C,))
        # NOTE: normalization uses multiply-by-reciprocal (scale = 1/var) instead
        # of a per-element divide; exact for the default var=128 (power of two).
        scale_c = (1.0 / var_c.astype(np.float32)).astype(np.float32)
        bias_c = (-mean_c.astype(np.float32) * scale_c).astype(np.float32)
        # cv2 Scalar semantics for the border value: missing components -> 0,
        # then saturate-cast to the input image dtype (padding happens before the
        # float conversion in the reference module).
        fill = np.array(
            [float(self.mean_val[i]) if i < len(self.mean_val) else 0.0
             for i in range(C)],
            dtype=np.float64,
        )
        if np.issubdtype(np_dtype, np.integer):
            info = np.iinfo(np_dtype)
            fill = np.clip(np.rint(fill), info.min, info.max)
        return (
            jnp.asarray(scale_c, jnp.float32),
            jnp.asarray(bias_c, jnp.float32),
            jnp.asarray(fill.astype(np.float32), jnp.float32),
        )

    def __call__(self, imagelist):
        # Bucket by (shape, dtype) so same-shape images share one pallas_call.
        buckets = {}
        for idx, img in enumerate(imagelist):
            key = (tuple(img.shape), np.dtype(img.dtype).str)
            buckets.setdefault(key, []).append(idx)

        results = [None] * len(imagelist)
        for (shape, dtstr), idxs in buckets.items():
            H, W, C = shape
            # Keep the NATIVE dtype (uint8 stays uint8) -> smaller transfer and
            # smaller HBM read; the f32 cast happens inside the fused pre-pass.
            x = jnp.stack([jnp.asarray(imagelist[i]) for i in idxs], axis=0)
            scale_c, bias_c, fill_c = self._channel_params(C, np.dtype(dtstr))
            out = _pad_mvn_batched(x, scale_c, bias_c, fill_c, pad=self.padval)
            for j, i in enumerate(idxs):
                results[i] = out[j:j + 1]  # (1, C, Hp, Wp) == NCHW
        return results


# --------------------------- pure-numpy reference ----------------------------
def _reference(img, mean, var, mean_val, padval):
    img = np.asarray(img)
    H, W, C = img.shape
    fill = np.array(
        [float(mean_val[i]) if i < len(mean_val) else 0.0 for i in range(C)],
        dtype=np.float64,
    )
    if np.issubdtype(img.dtype, np.integer):
        info = np.iinfo(img.dtype)
        fill = np.clip(np.rint(fill), info.min, info.max)
    padded = np.empty((H + 2 * padval, W + 2 * padval, C), np.float32)
    for c in range(C):
        padded[..., c] = np.pad(
            img[..., c].astype(np.float32), padval,
            constant_values=np.float32(fill[c])
        )
    chw = np.transpose(padded, (2, 0, 1))[None]
    m = np.broadcast_to(np.asarray(mean, np.float32).reshape(-1), (C,)).reshape(1, C, 1, 1)
    v = np.broadcast_to(np.asarray(var, np.float32).reshape(-1), (C,)).reshape(1, C, 1, 1)
    return (chw - m) / v


# --------------------------------- main ---------------------------------------
if __name__ == "__main__":
    key = jax.random.PRNGKey(0)
    k0, k1, k2, k3 = jax.random.split(key, 4)

    # Two float32 images sharing a shape (exercises the batched path), one with a
    # different shape, and one uint8 image (exercises the native-dtype transfer
    # and cv2 saturate-cast of the border value).
    img0 = jax.random.uniform(k0, (16, 16, 3), jnp.float32, 0.0, 255.0)
    img1 = jax.random.uniform(k1, (16, 16, 3), jnp.float32, 0.0, 255.0)
    img2 = jax.random.uniform(k2, (12, 20, 3), jnp.float32, 0.0, 255.0)
    img3 = jax.random.randint(k3, (16, 16, 3), 0, 256, jnp.int32).astype(jnp.uint8)
    imagelist = [img0, img1, img2, img3]

    module = NekoListPaddingRgbMvnDev({"mean": [127.5], "var": [128], "padval": 3})
    outs = module(imagelist)
    outs = [jax.block_until_ready(o) for o in outs]

    for img, out in zip(imagelist, outs):
        ref = _reference(np.asarray(img), module.mean_val, module.var_val,
                         module.mean_val, module.padval)
        assert out.shape == ref.shape, (out.shape, ref.shape)
        np.testing.assert_allclose(np.asarray(out), ref, rtol=1e-6, atol=1e-6)

    print("KERNEL_OK")
</pallas_src>

<mosaic_0001>
module attributes {stable_mosaic.version = 11 : i64} {
  func.func @_mvn_kernel(%arg0: i32, %arg1: memref<1x1452xf32, #tpu.memory_space<vmem>>, %arg2: memref<1x1452xf32, #tpu.memory_space<vmem>>, %arg3: memref<2x1452xf32, #tpu.memory_space<vmem>>, %arg4: memref<2x1452xf32, #tpu.memory_space<vmem>>) attributes {dimension_semantics = [#tpu.dimension_semantics<parallel>], iteration_bounds = array<i64: 1>, scalar_prefetch = 0 : i64, scratch_operands = 0 : i64, tpu.core_type = #tpu.core_type<tc>, window_params = [{pipeline_mode = #tpu.pipeline_mode<synchronous>, transform_indices = @transform_0, window_bounds = array<i64: 1, 1452>}, {pipeline_mode = #tpu.pipeline_mode<synchronous>, transform_indices = @transform_1, window_bounds = array<i64: 1, 1452>}, {transform_indices = @transform_2, window_bounds = array<i64: 2, 1452>}, {transform_indices = @transform_3, window_bounds = array<i64: 2, 1452>}]} {
    %c0 = arith.constant 0 : index
    %c0_0 = arith.constant 0 : index
    %0 = vector.load %arg3[%c0, %c0_0] : memref<2x1452xf32, #tpu.memory_space<vmem>>, vector<2x1452xf32>
    %c0_1 = arith.constant 0 : index
    %c0_2 = arith.constant 0 : index
    %1 = vector.load %arg1[%c0_1, %c0_2] : memref<1x1452xf32, #tpu.memory_space<vmem>>, vector<1x1452xf32>
    %2 = vector.broadcast %1 : vector<1x1452xf32> to vector<2x1452xf32>
    %3 = arith.mulf %0, %2 : vector<2x1452xf32>
    %c0_3 = arith.constant 0 : index
    %c0_4 = arith.constant 0 : index
    %4 = vector.load %arg2[%c0_3, %c0_4] : memref<1x1452xf32, #tpu.memory_space<vmem>>, vector<1x1452xf32>
    %5 = vector.broadcast %4 : vector<1x1452xf32> to vector<2x1452xf32>
    %6 = arith.addf %3, %5 : vector<2x1452xf32>
    %c0_5 = arith.constant 0 : index
    %c0_6 = arith.constant 0 : index
    %7 = vector.load %arg4[%c0_5, %c0_6] : memref<2x1452xf32, #tpu.memory_space<vmem>>, vector<2x1452xf32>
    tpu.vector_store %arg4[%c0_5, %c0_6], %6 {strides = array<i32>} : memref<2x1452xf32, #tpu.memory_space<vmem>>, vector<2x1452xf32>,
    return
  }
  func.func @transform_0(%arg0: i32) -> (i32, i32) {
    %c0_i32 = arith.constant 0 : i32
    %c0_i32_0 = arith.constant 0 : i32
    %c0_i32_1 = arith.constant 0 : i32
    return %c0_i32, %c0_i32_0 : i32, i32
  }
  func.func @transform_1(%arg0: i32) -> (i32, i32) {
    %c0_i32 = arith.constant 0 : i32
    %c0_i32_0 = arith.constant 0 : i32
    %c0_i32_1 = arith.constant 0 : i32
    return %c0_i32, %c0_i32_0 : i32, i32
  }
  func.func @transform_2(%arg0: i32) -> (i32, i32) {
    %c0_i32 = arith.constant 0 : i32
    %c0_i32_0 = arith.constant 0 : i32
    return %arg0, %c0_i32 : i32, i32
  }
  func.func @transform_3(%arg0: i32) -> (i32, i32) {
    %c0_i32 = arith.constant 0 : i32
    %c0_i32_0 = arith.constant 0 : i32
    return %arg0, %c0_i32 : i32, i32
  }
}

</mosaic_0001>

<bundles_post_ra>
// kernel: _pad_mvn_batched.1
= control target key start
LH: loop header
LB: loop body
LE: loop exit
PB: predicated region body
PF: predicated region fallthrough
CT: control target
= control target key end

     0   :  { %v21_v0 = vlaneseq  ;;  %v250_v1 = vmov 1983009808   ;;  %vm237_vm0 = vcmask 1041408   ;;  %vm238_vm1 = vcmask 1043458   ;;  %s341_s0 = inlined_call_operand.vmem [shape: f32[1,1452], index: 0, kind: input, shape index: {}]   ;;  %s342_s1 = inlined_call_operand.vmem [shape: f32[1,1452], index: 1, kind: input, shape index: {}]   ;;  %s343_s2 = inlined_call_operand.vmem [shape: f32[2,1452], index: 2, kind: input, shape index: {}]   ;;  %s344_s3 = inlined_call_operand.vmem [shape: f32[2,1452], index: 3, kind: output, shape index: {}]  }
   0x1   :  { %v72_v2 = vunpack.c.l.s4 %v250_v1  ;;  %v17_v4 = vld [vmem:[%s341_s0] sm:$0xff]  ;;  %v18_v35 = vld [vmem:[%s341_s0 + $0x8] sm:$0xf]  ;;  %vm239_vm2 = vmor %vm238_vm1, %vm237_vm0  ;;  %vm240_vm3 = vcmask 1045508   ;;  %vm242_vm5 = vcmask 359430  }
   0x2   :  { %v22_v3 = vshrl.u32 %v21_v0, 7  ;;  %v126_v10 = vld [vmem:[%s342_s1] sm:$0xff]  ;;  %v127_v45 = vld [vmem:[%s342_s1 + $0x8] sm:$0xf]  ;;  %vm241_vm4 = vmor %vm240_vm3, %vm239_vm2 }
   0x3   :  { %v73_v5 = vunpack.c.0.s8 %v72_v2  ;;  %v14_v36 = vld [vmem:[%s343_s2] sm:$0xff]  ;;  %v15_v59 = vld [vmem:[%s343_s2 + $0x8] sm:$0xff]  ;;  %vm243_vm6 = vmor %vm242_vm5, %vm241_vm4 }
   0x4   :  { %v274_v6 = vsub.s32 0, %v22_v3  ;;  %v276_v7 = vsub.s32 1, %v22_v3  ;;  %v278_v8 = vsub.s32 2, %v22_v3  ;;  %v280_v9 = vsub.s32 3, %v22_v3 }
   0x5   :  { %v285_v11 = vsub.s32 %v73_v5, %v22_v3  ;;  %v39_v12 = vsub.s32 4, %v22_v3  ;;  %v43_v13 = vsub.s32 5, %v22_v3  ;;  %v47_v14 = vsub.s32 6, %v22_v3 }
   0x6   :  { %v24_v15 = vrot.slane %v17_v4, %v274_v6  ;;  %v28_v16 = vrot.slane %v17_v4, %v276_v7  ;;  %v32_v17 = vrot.slane %v17_v4, %v278_v8  ;;  %v36_v18 = vrot.slane %v17_v4, %v280_v9 }
   0x7   :  { %v133_v19 = vrot.slane %v126_v10, %v274_v6  ;;  %v137_v20 = vrot.slane %v126_v10, %v276_v7  ;;  %v141_v21 = vrot.slane %v126_v10, %v278_v8  ;;  %v145_v22 = vrot.slane %v126_v10, %v280_v9 }
   0x8   :  { %v69_v23 = vcombine.low %v24_v15, %v28_v16  ;;  %v70_v24 = vcombine.low %v32_v17, %v36_v18  ;;  %v40_v25 = vrot.slane %v17_v4, %v39_v12  ;;  %v44_v26 = vrot.slane %v17_v4, %v43_v13 }
   0x9   :  { %v178_v27 = vcombine.low %v133_v19, %v137_v20  ;;  %v179_v28 = vcombine.low %v141_v21, %v145_v22  ;;  %v48_v29 = vrot.slane %v17_v4, %v47_v14  ;;  %v51_v30 = vsub.s32 7, %v22_v3 }
   0xa   :  { %v77_v31 = vrot.slane %v69_v23, %v285_v11  ;;  %v84_v32 = vrot.slane %v70_v24, %v285_v11  ;;  %v86_v33 = vcombine.low %v40_v25, %v44_v26  ;;  %v149_v34 = vrot.slane %v126_v10, %v39_v12 }
   0xb   :  { %v186_v37 = vrot.slane %v178_v27, %v285_v11  ;;  %v193_v38 = vrot.slane %v179_v28, %v285_v11  ;;  %v52_v39 = vrot.slane %v17_v4, %v51_v30  ;;  %v153_v40 = vrot.slane %v126_v10, %v43_v13 }
   0xc   :  { %v85_v41 = vcombine.low %v77_v31, %v84_v32  ;;  %v94_v42 = vrot.slane %v86_v33, %v285_v11  ;;  %v157_v43 = vrot.slane %v126_v10, %v47_v14  ;;  %v161_v44 = vrot.slane %v126_v10, %v51_v30 }
   0xd   :  { %v194_v46 = vcombine.low %v186_v37, %v193_v38  ;;  %v87_v47 = vcombine.low %v48_v29, %v52_v39  ;;  %v195_v48 = vcombine.low %v149_v34, %v153_v40  ;;  %v56_v49 = vrot.slane %v18_v35, %v274_v6 }
   0xe   :  { %v123_v50 = vmul.f32 %v85_v41, %v14_v36  ;;  %v196_v51 = vcombine.low %v157_v43, %v161_v44  ;;  %v60_v52 = vrot.slane %v18_v35, %v276_v7  ;;  %v64_v53 = vrot.slane %v18_v35, %v278_v8 }
   0xf   :  { %v101_v54 = vrot.slane %v87_v47, %v285_v11  ;;  %v203_v55 = vrot.slane %v195_v48, %v285_v11  ;;  %v68_v56 = vrot.slane %v18_v35, %v280_v9  ;;  %v165_v57 = vrot.slane %v127_v45, %v274_v6 }
  0x10   :  { %v232_v58 = vadd.f32 %v194_v46, %v123_v50  ;;  %v210_v60 = vrot.slane %v196_v51, %v285_v11  ;;  %v103_v61 = vcombine.low %v56_v49, %v60_v52  ;;  %v169_v62 = vrot.slane %v127_v45, %v276_v7 }
  0x11   :  { %v102_v63 = vcombine.low %v94_v42, %v101_v54  ;;  %v104_v0 = vcombine.low %v64_v53, %v68_v56  ;;  %v173_v1 = vrot.slane %v127_v45, %v278_v8  ;;  %v177_v2 = vrot.slane %v127_v45, %v280_v9  ;;  %v16_v8 = vld [vmem:[%s343_s2 + $0x10] sm:$0xff] }
  0x12   :  { %235 = vst [vmem:[%s344_s3] sm:$0xff] %v232_v58  ;;  %v211_v3 = vcombine.low %v203_v55, %v210_v60  ;;  %v111_v4 = vrot.slane %v103_v61, %v285_v11  ;;  %v212_v5 = vcombine.low %v165_v57, %v169_v62 }
  0x13   :  { %v124_v6 = vmul.f32 %v102_v63, %v15_v59  ;;  %v118_v7 = vrot.slane %v104_v0, %v285_v11  ;;  %v213_v10 = vcombine.low %v173_v1, %v177_v2 }
  0x14   :  { %v220_v9 = vrot.slane %v212_v5, %v285_v11 }
  0x15   :  { %v233_v12 = vadd.f32 %v211_v3, %v124_v6  ;;  %v119_v13 = vcombine.low %v111_v4, %v118_v7  ;;  %v227_v14 = vrot.slane %v213_v10, %v285_v11 }
  0x17   :  { %236 = vst [vmem:[%s344_s3 + $0x8] sm:$0xff] %v233_v12  ;;  %v125_v15 = vmul.f32 %v119_v13, %v16_v8  ;;  %v228_v16 = vcombine.low %v220_v9, %v227_v14 }
  0x19   :  { %v234_v17 = vadd.f32 %v228_v16, %v125_v15 }
  0x1b   :  { %244 = vst.msk [vmem:[%s344_s3 + $0x10] sm:$0xff] %vm243_vm6, %v234_v17 }

</bundles_post_ra>
